<compile_context>
chip_gen: v7x
topology: tpu7x:2x2x1
jax: 0.10.0
libtpu: 0.0.40
codegen_flags: <defaults>
</compile_context>

<pallas_src>
import jax
import jax.numpy as jnp
from jax.experimental import pallas as pl
from jax.experimental.pallas import tpu as pltpu

INPUT_SIZE = 1
OUTPUT_SIZE = 9
HIDDEN = [5, 10, 20, 5]

LAYER_SIZES = [INPUT_SIZE] + HIDDEN + [OUTPUT_SIZE]   # [1, 5, 10, 20, 5, 9]
IN_SIZES = LAYER_SIZES[:-1]                           # [1, 5, 10, 20, 5]
OUT_SIZES = LAYER_SIZES[1:]                           # [5, 10, 20, 5, 9]
N_LAYERS = len(OUT_SIZES)

MAX_IN = max(IN_SIZES)                                # 20
BIAS_COL = MAX_IN                                     # column 20 holds the bias
PACK_COLS = MAX_IN + 1                                # 21
ROW_OFFSETS = [0]
for _o in OUT_SIZES:
    ROW_OFFSETS.append(ROW_OFFSETS[-1] + _o)
PACK_ROWS = ROW_OFFSETS[-1]                           # 49


def cgnn_kernel(p_ref, x_ref, o_ref):
    """p_ref: (49, 21) packed params; x_ref: (1, BT); o_ref: (9, BT). Batch on lanes."""
    x = x_ref[...]                       # (INPUT_SIZE, BT) f32
    P = p_ref[...]                       # (49, 21) f32, resident across grid steps

    h = x
    for idx in range(N_LAYERS):
        r0, r1 = ROW_OFFSETS[idx], ROW_OFFSETS[idx + 1]
        in_f = IN_SIZES[idx]
        w = P[r0:r1, 0:in_f]                       # (out, in)
        b = P[r0:r1, BIAS_COL:BIAS_COL + 1]        # (out, 1) broadcasts along batch
        if in_f == 1:
            # K=1: outer product -> VPU broadcast multiply, skip the MXU.
            h = w * h + b
        else:
            h = jnp.dot(w, h, preferred_element_type=jnp.float32) + b
        if idx < N_LAYERS - 1:
            h = jnp.maximum(h, 0.0)

    o_ref[...] = h.astype(o_ref.dtype)             # (9, BT), lane-dense store


def pack_params(params):
    """params: list of (W (out,in), b (out,)) in PyTorch layout -> (49, 21) buffer."""
    buf = jnp.zeros((PACK_ROWS, PACK_COLS), jnp.float32)
    for idx, (w, b) in enumerate(params):
        out_f, in_f = w.shape
        r0 = ROW_OFFSETS[idx]
        buf = buf.at[r0:r0 + out_f, 0:in_f].set(w.astype(jnp.float32))
        buf = buf.at[r0:r0 + out_f, BIAS_COL].set(b.astype(jnp.float32))
    return buf


def cgnn_forward(x, packed_params, *, b_tile=2048):
    """x: (B, INPUT_SIZE) f32. Returns (B, OUTPUT_SIZE) f32 (PyTorch semantics)."""
    B = x.shape[0]
    x_t = jnp.transpose(x).astype(jnp.float32)     # (INPUT_SIZE, B): batch -> lane axis

    # Tile the batch; multiple of 128 lanes, padded tail handled by zero-pad + slice.
    bt = b_tile if B >= b_tile else max(128, ((B + 127) // 128) * 128)
    n_tiles = pl.cdiv(B, bt)
    b_pad = n_tiles * bt
    if b_pad != B:
        x_t = jnp.pad(x_t, ((0, 0), (0, b_pad - B)))

    out_t = pl.pallas_call(
        cgnn_kernel,
        out_shape=jax.ShapeDtypeStruct((OUTPUT_SIZE, b_pad), jnp.float32),
        grid=(n_tiles,),
        in_specs=[
            # Packed params: constant index_map -> fetched once, VMEM-resident.
            pl.BlockSpec((PACK_ROWS, PACK_COLS), lambda i: (0, 0)),
            # Input: (1, bt) tile, batch tiled along lanes.
            pl.BlockSpec((INPUT_SIZE, bt), lambda i: (0, i)),
        ],
        out_specs=pl.BlockSpec((OUTPUT_SIZE, bt), lambda i: (0, i)),
        compiler_params=pltpu.CompilerParams(
            dimension_semantics=("parallel",),      # shard batch across TCs on v7x
            vmem_limit_bytes=32 * 1024 * 1024,      # safe on v5e/v6e/v7x for this tile
        ),
    )(packed_params, x_t)

    return jnp.transpose(out_t[:, :B])              # back to (B, 9)


def init_params(key):
    """PyTorch nn.Linear default init: uniform(+-1/sqrt(fan_in)); W stored (out, in)."""
    params = []
    for i in range(len(LAYER_SIZES) - 1):
        fan_in, fan_out = LAYER_SIZES[i], LAYER_SIZES[i + 1]
        key, kw, kb = jax.random.split(key, 3)
        bound = 1.0 / jnp.sqrt(jnp.float32(fan_in))
        w = jax.random.uniform(kw, (fan_out, fan_in), jnp.float32, -bound, bound)
        b = jax.random.uniform(kb, (fan_out,), jnp.float32, -bound, bound)
        params.append((w, b))
    return params


def reference_forward(x, params):
    h = x
    for i, (w, b) in enumerate(params):
        h = h @ w.T + b
        if i < len(params) - 1:
            h = jnp.maximum(h, 0.0)
    return h


if __name__ == "__main__":
    key = jax.random.PRNGKey(0)
    key, kx1, kx2 = jax.random.split(key, 3)
    params = init_params(key)
    packed = pack_params(params)

    # Small batch (single tile, padded to 128 lanes).
    batch = 8
    x = jax.random.normal(kx1, (batch, INPUT_SIZE), jnp.float32)
    out = jax.block_until_ready(cgnn_forward(x, packed))
    ref = reference_forward(x, params)
    assert out.shape == (batch, OUTPUT_SIZE)
    assert jnp.allclose(out, ref, atol=1e-5, rtol=1e-5)

    # Multi-tile path with a ragged tail (exercises the batch grid + padding).
    batch2 = 300
    x2 = jax.random.normal(kx2, (batch2, INPUT_SIZE), jnp.float32)
    out2 = jax.block_until_ready(cgnn_forward(x2, packed, b_tile=128))
    ref2 = reference_forward(x2, params)
    assert out2.shape == (batch2, OUTPUT_SIZE)
    assert jnp.allclose(out2, ref2, atol=1e-5, rtol=1e-5)

    print("KERNEL_OK")
</pallas_src>

<mosaic_0001>
module attributes {stable_mosaic.version = 11 : i64} {
  func.func @cgnn_kernel(%arg0: i32, %arg1: memref<49x21xf32, #tpu.memory_space<vmem>>, %arg2: memref<1x128xf32, #tpu.memory_space<vmem>>, %arg3: memref<9x128xf32, #tpu.memory_space<vmem>>) attributes {dimension_semantics = [#tpu.dimension_semantics<parallel>], iteration_bounds = array<i64: 1>, scalar_prefetch = 0 : i64, scratch_operands = 0 : i64, tpu.core_type = #tpu.core_type<tc>, window_params = [{pipeline_mode = #tpu.pipeline_mode<synchronous>, transform_indices = @transform_0, window_bounds = array<i64: 49, 21>}, {transform_indices = @transform_1, window_bounds = array<i64: 1, 128>}, {transform_indices = @transform_2, window_bounds = array<i64: 9, 128>}]} {
    %c0 = arith.constant 0 : index
    %c0_0 = arith.constant 0 : index
    %0 = vector.load %arg2[%c0, %c0_0] : memref<1x128xf32, #tpu.memory_space<vmem>>, vector<1x128xf32>
    %c0_1 = arith.constant 0 : index
    %c0_2 = arith.constant 0 : index
    %1 = vector.load %arg1[%c0_1, %c0_2] : memref<49x21xf32, #tpu.memory_space<vmem>>, vector<49x21xf32>
    %2 = vector.extract_strided_slice %1 {offsets = [0, 0], sizes = [5, 1], strides = [1, 1]} : vector<49x21xf32> to vector<5x1xf32>
    %3 = vector.extract_strided_slice %1 {offsets = [0, 20], sizes = [5, 1], strides = [1, 1]} : vector<49x21xf32> to vector<5x1xf32>
    %4 = vector.broadcast %2 : vector<5x1xf32> to vector<5x128xf32>
    %5 = vector.broadcast %0 : vector<1x128xf32> to vector<5x128xf32>
    %6 = arith.mulf %4, %5 : vector<5x128xf32>
    %7 = vector.broadcast %3 : vector<5x1xf32> to vector<5x128xf32>
    %8 = arith.addf %6, %7 : vector<5x128xf32>
    %cst = arith.constant 0.000000e+00 : f32
    %9 = vector.broadcast %cst : f32 to vector<5x128xf32>
    %10 = arith.maximumf %8, %9 : vector<5x128xf32>
    %11 = vector.extract_strided_slice %1 {offsets = [5, 0], sizes = [10, 5], strides = [1, 1]} : vector<49x21xf32> to vector<10x5xf32>
    %12 = vector.extract_strided_slice %1 {offsets = [5, 20], sizes = [10, 1], strides = [1, 1]} : vector<49x21xf32> to vector<10x1xf32>
    %cst_3 = arith.constant dense<0.000000e+00> : vector<10x128xf32>
    %13 = tpu.matmul %11, %10, %cst_3 {dimension_numbers = #tpu.dot_dimension_numbers<[1], [0], [0], [1], [0, 0, 1, 1], [], []>} : vector<10x5xf32>, vector<5x128xf32>, vector<10x128xf32> -> vector<10x128xf32>
    %14 = vector.broadcast %12 : vector<10x1xf32> to vector<10x128xf32>
    %15 = arith.addf %13, %14 : vector<10x128xf32>
    %cst_4 = arith.constant 0.000000e+00 : f32
    %16 = vector.broadcast %cst_4 : f32 to vector<10x128xf32>
    %17 = arith.maximumf %15, %16 : vector<10x128xf32>
    %18 = vector.extract_strided_slice %1 {offsets = [15, 0], sizes = [20, 10], strides = [1, 1]} : vector<49x21xf32> to vector<20x10xf32>
    %19 = vector.extract_strided_slice %1 {offsets = [15, 20], sizes = [20, 1], strides = [1, 1]} : vector<49x21xf32> to vector<20x1xf32>
    %cst_5 = arith.constant dense<0.000000e+00> : vector<20x128xf32>
    %20 = tpu.matmul %18, %17, %cst_5 {dimension_numbers = #tpu.dot_dimension_numbers<[1], [0], [0], [1], [0, 0, 1, 1], [], []>} : vector<20x10xf32>, vector<10x128xf32>, vector<20x128xf32> -> vector<20x128xf32>
    %21 = vector.broadcast %19 : vector<20x1xf32> to vector<20x128xf32>
    %22 = arith.addf %20, %21 : vector<20x128xf32>
    %cst_6 = arith.constant 0.000000e+00 : f32
    %23 = vector.broadcast %cst_6 : f32 to vector<20x128xf32>
    %24 = arith.maximumf %22, %23 : vector<20x128xf32>
    %25 = vector.extract_strided_slice %1 {offsets = [35, 0], sizes = [5, 20], strides = [1, 1]} : vector<49x21xf32> to vector<5x20xf32>
    %26 = vector.extract_strided_slice %1 {offsets = [35, 20], sizes = [5, 1], strides = [1, 1]} : vector<49x21xf32> to vector<5x1xf32>
    %cst_7 = arith.constant dense<0.000000e+00> : vector<5x128xf32>
    %27 = tpu.matmul %25, %24, %cst_7 {dimension_numbers = #tpu.dot_dimension_numbers<[1], [0], [0], [1], [0, 0, 1, 1], [], []>} : vector<5x20xf32>, vector<20x128xf32>, vector<5x128xf32> -> vector<5x128xf32>
    %28 = vector.broadcast %26 : vector<5x1xf32> to vector<5x128xf32>
    %29 = arith.addf %27, %28 : vector<5x128xf32>
    %cst_8 = arith.constant 0.000000e+00 : f32
    %30 = vector.broadcast %cst_8 : f32 to vector<5x128xf32>
    %31 = arith.maximumf %29, %30 : vector<5x128xf32>
    %32 = vector.extract_strided_slice %1 {offsets = [40, 0], sizes = [9, 5], strides = [1, 1]} : vector<49x21xf32> to vector<9x5xf32>
    %33 = vector.extract_strided_slice %1 {offsets = [40, 20], sizes = [9, 1], strides = [1, 1]} : vector<49x21xf32> to vector<9x1xf32>
    %cst_9 = arith.constant dense<0.000000e+00> : vector<9x128xf32>
    %34 = tpu.matmul %32, %31, %cst_9 {dimension_numbers = #tpu.dot_dimension_numbers<[1], [0], [0], [1], [0, 0, 1, 1], [], []>} : vector<9x5xf32>, vector<5x128xf32>, vector<9x128xf32> -> vector<9x128xf32>
    %35 = vector.broadcast %33 : vector<9x1xf32> to vector<9x128xf32>
    %36 = arith.addf %34, %35 : vector<9x128xf32>
    %c0_10 = arith.constant 0 : index
    %c0_11 = arith.constant 0 : index
    %37 = vector.load %arg3[%c0_10, %c0_11] : memref<9x128xf32, #tpu.memory_space<vmem>>, vector<9x128xf32>
    tpu.vector_store %arg3[%c0_10, %c0_11], %36 {strides = array<i32>} : memref<9x128xf32, #tpu.memory_space<vmem>>, vector<9x128xf32>,
    return
  }
  func.func @transform_0(%arg0: i32) -> (i32, i32) {
    %c0_i32 = arith.constant 0 : i32
    %c0_i32_0 = arith.constant 0 : i32
    %c0_i32_1 = arith.constant 0 : i32
    return %c0_i32, %c0_i32_0 : i32, i32
  }
  func.func @transform_1(%arg0: i32) -> (i32, i32) {
    %c0_i32 = arith.constant 0 : i32
    %c0_i32_0 = arith.constant 0 : i32
    return %c0_i32, %arg0 : i32, i32
  }
  func.func @transform_2(%arg0: i32) -> (i32, i32) {
    %c0_i32 = arith.constant 0 : i32
    %c0_i32_0 = arith.constant 0 : i32
    return %c0_i32, %arg0 : i32, i32
  }
}

</mosaic_0001>

<bundles_post_ra>
// kernel: tpu_custom_call.1
= control target key start
LH: loop header
LB: loop body
LE: loop exit
PB: predicated region body
PF: predicated region fallthrough
CT: control target
= control target key end

     0   :  { %v555_v2 = vmov 0   ;;  %v556_v3 = vmov 20   ;;  %s648_s0 = inlined_call_operand.vmem [shape: f32[49,21], index: 0, kind: input, shape index: {}]   ;;  %s649_s1 = inlined_call_operand.vmem [shape: f32[1,128], index: 1, kind: input, shape index: {}]   ;;  %s650_s2 = inlined_call_operand.hbm [shape: f32[9,128], index: 2, kind: output, shape index: {}]  }
   0x1   :  { %v13_v0 = vld [vmem:[%s648_s0] sm:$0xff]  ;;  %v14_v1 = vld [vmem:[%s648_s0 + $0x8] sm:$0xff]  ;;  %528 = vset.pattern.permute.xlu0 %v555_v2  ;;  %530 = vset.pattern.permute.xlu1 %v556_v3  ;;  %v15_v4 = vld [vmem:[%s648_s0 + $0x10] sm:$0xff] }
   0x2   :  { %22 = vperm.xlu0 %528, %v13_v0   ;;  %40 = vperm.xlu1 %530, %v14_v1  }
   0x3   :  { %7 = vsyncpa [#allocation3], 0  ;;  %v43_v5 = vrot.slane %v13_v0, 5  ;;  %v44_v6 = vrot.slane %v14_v1, 5  ;;  %v16_v7 = vld [vmem:[%s648_s0 + $0x18] sm:$0xff]  ;;  %v594_v8 = vld [vmem:[%s648_s0 + $0x20] sm:$0xff] }
   0x4   :  { %vm42_vm0 = vcmask 1042432   ;;  %vm51_vm1 = vcmask 39936   ;;  %v601_v10 = vld [vmem:[%s648_s0 + $0x30] sm:$0x1]  ;;  %v607_v11 = vld [vmem:[%s648_s0 + $0x28] sm:$0xff]  ;;  %vm56_vm2 = vcmask 1044480  }
   0x5   :  { %v45_v9 = vsel %vm42_vm0, %v43_v5, %v44_v6  ;;  %v452_v13 = vld [vmem:[%s649_s1] ss:$0 sm:$0xff]  ;;  %v150_v18 = vrot.slane %v14_v1, 7  ;;  %v151_v19 = vrot.slane %v15_v4, 7  ;;  %v557_v20 = vmov 0.0|0.0   ;;  %s561_s0 = smov [#allocation2]  }
   0x6   :  { %529 = vset.pattern.permute.xlu0 %v556_v3  ;;  %139 = vperm.xlu1 %530, %v15_v4   ;;  %vm149_vm3 = vcmask 1040384   ;;  %v153_v21 = vrot.slane %v16_v7, 7  ;;  %vm558_vm4 = vmmov 0   ;;  %v559_v23 = vmov 0.0   ;;  %s441_s1 = sshll.u32 %s561_s0, 4  ;;  %s442_s1 = int_to_ptr.vmem [resolvable:$true] %s441_s1 }
   0x7   :  { %33 = vperm.xlu0 %529, %v13_v0   ;;  %482 = vmatprep.mubr.msk.f32.mxu0 %vm51_vm1, %v45_v9  ;;  %v152_v22 = vsel %vm149_vm3, %v150_v18, %v151_v19  ;;  %v155_v24 = vrot.slane %v594_v8, 7  ;;  %vm174_vm5 = vcmask 1041408   ;;  %vm560_vm6 = vmmov 1   ;;  %s531_s25 = scalar_lea.vmem %s442_s1, 256  ;;  %p536_p1 = scmp.lt.s32.totalorder %s442_s1, %s442_s1 }
   0x8   :  { %512 = vmatprep.subr.bf16.mxu1 %v557_v20  ;;  %489 = vmatprep.mubr.msk.f32.mxu1 %vm558_vm4, %v559_v23  ;;  %v154_v25 = vsel %vm149_vm3, %v151_v19, %v153_v21  ;;  %vm514_vm7 = vmpackc.low %vm174_vm5, %vm560_vm6  ;;  %vm167_vm8 = vcmask 80896   ;;  %v261_v60 = vrot.slane %v594_v8, 3  ;;  %vm267_vm9 = vcmask 1043456   ;;  %p532_p0 = scmp.ne.s32.totalorder %s442_s1, %s531_s25  ;;  %p537_p2 = scmp.lt.s32.totalorder %s531_s25, %s531_s25 }
   0x9   :  { %v156_v26 = vsel %vm149_vm3, %v153_v21, %v155_v24  ;;  %vm264_vm10 = vcmask 162816  }
   0xa   :  { %143 = vperm.xlu1 %530, %v16_v7   ;;  %p538_p3 = por %p537_p2, %p536_p1 }
   0xb   :  { %147 = vperm.xlu0 %529, %v594_v8  }
   0xc   :  { %p539_p4 = pnand %p538_p3, %p532_p0 }
   0xe   :  { %344 = vperm.xlu1 %530, %v607_v11  }
   0xf   :  { %349 = vperm.xlu0 %529, %v601_v10  }
  0x81   :  { %v23_v12 = vpop.permute.xlu0 %22  ;;  %v41_v27 = vpop.permute.xlu1 %40 }
  0x82   :  { %v31_v14 = vmul.f32 %v452_v13, %v23_v12  ;;  %v47_v28 = vrot.slane %v41_v27, 5  ;;  %v157_v39 = vrot.slane %v41_v27, 7 }
  0x85   :  { %v140_v38 = vpop.permute.xlu1 %139 }
  0x86   :  { %v34_v15 = vpop.permute.xlu0 %33  ;;  %v158_v40 = vrot.slane %v140_v38, 7 }
  0x87   :  { %v36_v16 = vadd.f32 %v34_v15, %v31_v14  ;;  %v46_v29 = vrot.slane %v34_v15, 5 }
  0x88   :  { %v159_v42 = vsel %vm149_vm3, %v157_v39, %v158_v40 }
  0x89   :  { %v37_v17 = vmax.f32 %v36_v16, 0.0  ;;  %v48_v32 = vsel %vm42_vm0, %v46_v29, %v47_v28  ;;  %v144_v41 = vpop.permute.xlu1 %143 }
  0x8a   :  { %v148_v44 = vpop.permute.xlu0 %147  ;;  %v160_v47 = vrot.slane %v144_v41, 7 }
  0x8b   :  { %480 = vmatprep.subr.msk.mxu0 %vm56_vm2, %v37_v17  ;;  %v162_v48 = vrot.slane %v148_v44, 7  ;;  %v262_v62 = vrot.slane %v148_v44, 3 }
  0x8c   :  { %481 = vmatpush3.msk.msra.mxu0 %vm56_vm2, %v37_v17  ;;  %v161_v49 = vsel %vm149_vm3, %v158_v40, %v160_v47 }
  0x8d   :  { %483 = vmatmul.mubr.msk.f32.vlgmr.msra.gmra.mrb[0].mxu0 %vm51_vm1, %v44_v6  ;;  %516 = vmatprep.subr.bf16.mxu0 %v557_v20  ;;  %v163_v55 = vsel %vm149_vm3, %v160_v47, %v162_v48  ;;  %v345_v5 = vpop.permute.xlu1 %344 }
  0x8e   :  { %504 = vmatprep.mubr.msk.f32.mxu0 %vm558_vm4, %v559_v23  ;;  %v350_v3 = vpop.permute.xlu0 %349 }
 0x160   :  { %v484_v30 = vpop.f32.mrb[0].mxu0 }
 0x161   :  { %v132_v31 = vadd.f32 %v484_v30, %v47_v28  ;;  %v126_v33 = vpop.f32.mrb[1].mxu0 }
 0x162   :  { %v127_v34 = vadd.f32 %v126_v33, %v48_v32 }
 0x163   :  { %v136_v35 = vmax.f32 %v132_v31, 0.0 }
 0x164   :  { %v135_v36 = vmax.f32 %v127_v34, 0.0 }
 0x166   :  { %v513_v37 = vpack.c.bf16 %v136_v35, %v135_v36 }
 0x168   :  { %515 = vmatpush3.bf16.msk.msra.mxu1 %vm514_vm7, %v513_v37 }
 0x16b   :  { %490 = vmatmul.mubr.msk.f32.vlgmr.msra.gmra.mrb[0].mxu1 %vm167_vm8, %v152_v22 }
 0x16c   :  { %492 = vmatprep.mubr.msk.f32.mxu1 %vm558_vm4, %v559_v23 }
 0x16f   :  { %493 = vmatmul.mubr.msk.f32.gmra.mrb[2].mxu1 %vm167_vm8, %v154_v25 }
 0x170   :  { %495 = vmatprep.mubr.msk.f32.mxu1 %vm558_vm4, %v559_v23 }
 0x173   :  { %496 = vmatmul.mubr.msk.f32.gmra.mrb[4].mxu1 %vm167_vm8, %v156_v26 }
 0x23e   :  { %v244_v43 = vpop.f32.mrb[0].mxu1 }
 0x23f   :  { %v245_v45 = vadd.f32 %v244_v43, %v159_v42  ;;  %v491_v46 = vpop.f32.mrb[1].mxu1 }
 0x241   :  { %v258_v53 = vmax.f32 %v245_v45, 0.0 }
 0x242   :  { %v249_v50 = vpop.f32.mrb[2].mxu1 }
 0x243   :  { %v250_v51 = vadd.f32 %v249_v50, %v161_v49  ;;  %v494_v52 = vpop.f32.mrb[3].mxu1 }
 0x245   :  { %v259_v54 = vmax.f32 %v250_v51, 0.0 }
 0x246   :  { %v254_v56 = vpop.f32.mrb[4].mxu1 }
 0x247   :  { %v517_v57 = vpack.c.bf16 %v259_v54, %v258_v53  ;;  %v255_v58 = vadd.f32 %v254_v56, %v163_v55  ;;  %v497_v59 = vpop.f32.mrb[5].mxu1 }
 0x249   :  { %518 = vmatpush3.bf16.msra.mxu0 %v517_v57  ;;  %v260_v61 = vmax.f32 %v255_v58, 0.0 }
 0x24a   :  { %502 = vmatprep.subr.mxu0 %v559_v23 }
 0x24d   :  { %503 = vmatpush3.msk.msra.mxu0 %vm267_vm9, %v260_v61 }
 0x24e   :  { %505 = vmatmul.mubr.msk.f32.vlgmr.msra.gmra.mrb[2].mxu0 %vm264_vm10, %v261_v60 }
 0x24f   :  { %509 = vmatprep.mubr.msk.f32.mxu0 %vm51_vm1, %v607_v11 }
 0x321   :  { %v337_v63 = vpop.f32.mrb[2].mxu0 }
 0x322   :  { %v338_v0 = vadd.f32 %v337_v63, %v262_v62  ;;  %v506_v1 = vpop.f32.mrb[3].mxu0 }
 0x324   :  { %v341_v2 = vmax.f32 %v338_v0, 0.0 }
 0x326   :  { %507 = vmatprep.subr.msk.mxu0 %vm56_vm2, %v341_v2 }
 0x327   :  { %508 = vmatpush3.msk.msra.mxu0 %vm56_vm2, %v341_v2 }
 0x328   :  { %510 = vmatmul.mubr.msk.f32.vlgmr.msra.gmra.mrb[4].mxu0 %vm51_vm1, %v601_v10 }
 0x3fb   :  { %v511_v4 = vpop.f32.mrb[4].mxu0 }
 0x3fc   :  { %v431_v6 = vadd.f32 %v511_v4, %v350_v3  ;;  %v425_v7 = vpop.f32.mrb[5].mxu0 }
 0x3fd   :  { %v426_v8 = vadd.f32 %v425_v7, %v345_v5 }
 0x3fe   :  { %435 = vst [vmem:[#allocation2 + $0x8] sm:$0x1] %v431_v6 }
 0x3ff   :  { %434 = vst [vmem:[#allocation2] sm:$0xff] %v426_v8 }
 0x400   :  { %542 = shalt.err (!%p539_p4)
}
 0x401   :  { %s543_s28 = scalar_lea.hbm %s650_s2, 256 }
 0x402   :  { %p544_p5 = scmp.ne.s32.totalorder %s650_s2, %s543_s28  ;;  %p547_p6 = scmp.lt.u32.totalorder %s543_s28, %s650_s2 }
 0x404   :  { %p549_p7 = pnand %p547_p6, %p544_p5 }
 0x406   :  { %552 = shalt.err (!%p549_p7)
}
 0x407   :  { %s562_s5 = smov 128   ;;  %s563_s6 = smov 8  }
 0x408   :  { %447 = dma.vmem_to_hbm [thread:$0]  %s442_s1, 256, %s650_s2, [#allocation3], %s562_s5, %s562_s5, %s563_s6  }
 0x409   :  { %553 = dma.done.wait [#allocation3], 256  }
 0x40a   :  { %554 = vsyncadd [#allocation3], 4294967040 }
 0x40b   :  { %451 = vsyncpa [#allocation3], 1 }

</bundles_post_ra>
